<compile_context>
chip_gen: v5e
topology: v5e:2x2
jax: 0.10.0
libtpu: 0.0.40
codegen_flags: <defaults>
</compile_context>

<pallas_src>
import jax
import jax.numpy as jnp
import numpy as np
from jax.experimental import pallas as pl
from jax.experimental.pallas import tpu as pltpu


def _resblock_ll_kernel(x_ref, wres_ref, bres_ref, w0a_ref, w0b_ref,
                        w1a_ref, w1b_ref, o_ref):
    # x_ref: (B_tile, C_in, L), o_ref: (B_tile, C_out, L); weights are 2D.
    b_tile, _, L = x_ref.shape

    wres = wres_ref[...]                      # (C_out, C_in)
    bres = bres_ref[...]                      # (C_out, 1) -> broadcasts over L
    w0a, w0b = w0a_ref[...], w0b_ref[...]     # (C_mid, C_in) per tap
    w1a, w1b = w1a_ref[...], w1b_ref[...]     # (C_out, C_mid) per tap

    # Lane mask that zeroes the t == L-1 column after the roll (the pad column).
    lane = jax.lax.broadcasted_iota(jnp.int32, (1, L), 1)
    keep = lane < (L - 1)

    def shift_next(a):
        # a[:, t] -> a[:, t + 1], zero at t = L-1  (== ConstantPad1d((0, 1), 0))
        # roll by L-1 along lanes: rolled[:, t] = a[:, (t + 1) % L]
        return jnp.where(keep, pltpu.roll(a, L - 1, 1), 0.0)

    def elu(z):
        # alpha = 1.0 (PyTorch default); clamp so the inactive branch stays finite.
        return jnp.where(z > 0, z, jnp.exp(jnp.minimum(z, 0.0)) - 1.0)

    for b in range(b_tile):                   # static unroll over the batch tile
        x = x_ref[b]                                              # (C_in, L)
        res = jnp.dot(wres, x, preferred_element_type=jnp.float32) + bres
        h0 = (jnp.dot(w0a, x, preferred_element_type=jnp.float32)
              + jnp.dot(w0b, shift_next(x), preferred_element_type=jnp.float32))
        h1 = elu(h0)                                              # (C_mid, L)
        h2 = (jnp.dot(w1a, h1, preferred_element_type=jnp.float32)
              + jnp.dot(w1b, shift_next(h1), preferred_element_type=jnp.float32))
        o_ref[b] = elu(h2 + res)                                  # (C_out, L)


def _pick_batch_tile(n):
    # Largest of {8, 4, 2} dividing n while keeping >= 2 grid steps, so the
    # per-step overhead is amortized but the "parallel" batch axis can still
    # be split across TensorCores. Otherwise fall back to 1.
    for t in (8, 4, 2):
        if n % t == 0 and n // t >= 2:
            return t
    return 1


def resblock_ll_forward(x_ncl, res_w, res_b, filt0, filt1):
    """x_ncl: (N, C_in, L); res_w: (C_out, C_in, 1); res_b: (C_out,);
    filt0: (C_mid, C_in, 2); filt1: (C_out, C_mid, 2).  Returns (N, C_out, L)."""
    N, C_in, L = x_ncl.shape
    C_mid = filt0.shape[0]
    C_out = res_w.shape[0]
    b_tile = _pick_batch_tile(N)

    x = x_ncl.astype(jnp.float32)                        # keep NCL, no transpose
    # Matmul-ready weights (tiny wrapper-side slices; compiled once).
    wres = res_w[:, :, 0].astype(jnp.float32)            # (C_out, C_in)
    bres = res_b.reshape(C_out, 1).astype(jnp.float32)   # (C_out, 1)
    w0a = filt0[:, :, 0].astype(jnp.float32)             # (C_mid, C_in)
    w0b = filt0[:, :, 1].astype(jnp.float32)
    w1a = filt1[:, :, 0].astype(jnp.float32)             # (C_out, C_mid)
    w1b = filt1[:, :, 1].astype(jnp.float32)

    def weight_spec(shape):
        # Grid-invariant block (same block index every step -> stays resident).
        return pl.BlockSpec(shape, lambda b: (0,) * len(shape))

    return pl.pallas_call(
        _resblock_ll_kernel,
        out_shape=jax.ShapeDtypeStruct((N, C_out, L), jnp.float32),
        grid_spec=pltpu.PrefetchScalarGridSpec(
            num_scalar_prefetch=0,
            grid=(N // b_tile,),
            in_specs=[
                pl.BlockSpec((b_tile, C_in, L), lambda b: (b, 0, 0)),
                weight_spec((C_out, C_in)),    # res_conv weight
                weight_spec((C_out, 1)),       # res_conv bias
                weight_spec((C_mid, C_in)),    # filt0 tap 0
                weight_spec((C_mid, C_in)),    # filt0 tap 1
                weight_spec((C_out, C_mid)),   # filt1 tap 0
                weight_spec((C_out, C_mid)),   # filt1 tap 1
            ],
            out_specs=pl.BlockSpec((b_tile, C_out, L), lambda b: (b, 0, 0)),
        ),
        compiler_params=pltpu.CompilerParams(dimension_semantics=("parallel",)),
    )(x, wres, bres, w0a, w0b, w1a, w1b)


def _ref_forward(x, res_w, res_b, filt0, filt1):
    """Pure-JAX reference mimicking the PyTorch module exactly (NCL layout)."""
    def conv1d(xin, w):  # xin: (N, Cin, Lp), w: (Cout, Cin, K)
        K = w.shape[-1]
        Lout = xin.shape[-1] - K + 1
        return sum(jnp.einsum('ncl,oc->nol', xin[:, :, k:k + Lout], w[:, :, k])
                   for k in range(K))

    pad = lambda a: jnp.pad(a, ((0, 0), (0, 0), (0, 1)))
    res = conv1d(x, res_w) + res_b[None, :, None]
    r0 = conv1d(pad(x), filt0)
    r1 = jax.nn.elu(r0)
    r2 = conv1d(pad(r1), filt1)
    return jax.nn.elu(r2 + res)


if __name__ == "__main__":
    key = jax.random.PRNGKey(0)
    N, C_in, C_mid, C_out, L = 2, 4, 8, 6, 16
    ks = jax.random.split(key, 5)

    x = jax.random.normal(ks[0], (N, C_in, L), jnp.float32)
    # deterministic synthetic parameters (module __init__ defines res_conv; the
    # external `filters` are kernel-size-2 conv1d weights so lengths line up)
    res_w = jax.random.normal(ks[1], (C_out, C_in, 1), jnp.float32) * 0.2
    res_b = jax.random.normal(ks[2], (C_out,), jnp.float32) * 0.1
    filt0 = jax.random.normal(ks[3], (C_mid, C_in, 2), jnp.float32) * 0.2
    filt1 = jax.random.normal(ks[4], (C_out, C_mid, 2), jnp.float32) * 0.2
    filters = [filt0, filt1]

    out = resblock_ll_forward(x, res_w, res_b, filters[0], filters[-1])
    out = jax.block_until_ready(out)

    ref = _ref_forward(x, res_w, res_b, filters[0], filters[-1])
    assert out.shape == (N, C_out, L)
    np.testing.assert_allclose(np.asarray(out), np.asarray(ref),
                               rtol=1e-5, atol=1e-5)
    print("KERNEL_OK")
</pallas_src>

<mosaic_0001>
module attributes {stable_mosaic.version = 11 : i64} {
  func.func @_resblock_ll_kernel(%arg0: i32, %arg1: memref<1x4x16xf32, #tpu.memory_space<vmem>>, %arg2: memref<6x4xf32, #tpu.memory_space<vmem>>, %arg3: memref<6x1xf32, #tpu.memory_space<vmem>>, %arg4: memref<8x4xf32, #tpu.memory_space<vmem>>, %arg5: memref<8x4xf32, #tpu.memory_space<vmem>>, %arg6: memref<6x8xf32, #tpu.memory_space<vmem>>, %arg7: memref<6x8xf32, #tpu.memory_space<vmem>>, %arg8: memref<1x6x16xf32, #tpu.memory_space<vmem>>) attributes {dimension_semantics = [#tpu.dimension_semantics<parallel>], iteration_bounds = array<i64: 2>, scalar_prefetch = 0 : i64, scratch_operands = 0 : i64, tpu.core_type = #tpu.core_type<tc>, window_params = [{transform_indices = @transform_0, window_bounds = array<i64: 1, 4, 16>}, {pipeline_mode = #tpu.pipeline_mode<synchronous>, transform_indices = @transform_1, window_bounds = array<i64: 6, 4>}, {pipeline_mode = #tpu.pipeline_mode<synchronous>, transform_indices = @transform_2, window_bounds = array<i64: 6, 1>}, {pipeline_mode = #tpu.pipeline_mode<synchronous>, transform_indices = @transform_3, window_bounds = array<i64: 8, 4>}, {pipeline_mode = #tpu.pipeline_mode<synchronous>, transform_indices = @transform_4, window_bounds = array<i64: 8, 4>}, {pipeline_mode = #tpu.pipeline_mode<synchronous>, transform_indices = @transform_5, window_bounds = array<i64: 6, 8>}, {pipeline_mode = #tpu.pipeline_mode<synchronous>, transform_indices = @transform_6, window_bounds = array<i64: 6, 8>}, {transform_indices = @transform_7, window_bounds = array<i64: 1, 6, 16>}]} {
    %c0 = arith.constant 0 : index
    %c0_0 = arith.constant 0 : index
    %0 = vector.load %arg2[%c0, %c0_0] : memref<6x4xf32, #tpu.memory_space<vmem>>, vector<6x4xf32>
    %c0_1 = arith.constant 0 : index
    %c0_2 = arith.constant 0 : index
    %1 = vector.load %arg3[%c0_1, %c0_2] : memref<6x1xf32, #tpu.memory_space<vmem>>, vector<6x1xf32>
    %c0_3 = arith.constant 0 : index
    %c0_4 = arith.constant 0 : index
    %2 = vector.load %arg4[%c0_3, %c0_4] : memref<8x4xf32, #tpu.memory_space<vmem>>, vector<8x4xf32>
    %c0_5 = arith.constant 0 : index
    %c0_6 = arith.constant 0 : index
    %3 = vector.load %arg5[%c0_5, %c0_6] : memref<8x4xf32, #tpu.memory_space<vmem>>, vector<8x4xf32>
    %c0_7 = arith.constant 0 : index
    %c0_8 = arith.constant 0 : index
    %4 = vector.load %arg6[%c0_7, %c0_8] : memref<6x8xf32, #tpu.memory_space<vmem>>, vector<6x8xf32>
    %c0_9 = arith.constant 0 : index
    %c0_10 = arith.constant 0 : index
    %5 = vector.load %arg7[%c0_9, %c0_10] : memref<6x8xf32, #tpu.memory_space<vmem>>, vector<6x8xf32>
    %6 = tpu.iota {dimensions = array<i32: 1>} : vector<1x16xi32>
    %c15_i32 = arith.constant 15 : i32
    %7 = vector.broadcast %c15_i32 : i32 to vector<1x16xi32>
    %8 = arith.cmpi slt, %6, %7 : vector<1x16xi32>
    %c0_11 = arith.constant 0 : index
    %c0_12 = arith.constant 0 : index
    %c0_13 = arith.constant 0 : index
    %9 = vector.load %arg1[%c0_11, %c0_12, %c0_13] : memref<1x4x16xf32, #tpu.memory_space<vmem>>, vector<1x4x16xf32>
    %10 = vector.shape_cast %9 : vector<1x4x16xf32> to vector<4x16xf32>
    %cst = arith.constant dense<0.000000e+00> : vector<6x16xf32>
    %11 = tpu.matmul %0, %10, %cst {dimension_numbers = #tpu.dot_dimension_numbers<[1], [0], [0], [1], [0, 0, 1, 1], [], []>} : vector<6x4xf32>, vector<4x16xf32>, vector<6x16xf32> -> vector<6x16xf32>
    %12 = vector.broadcast %1 : vector<6x1xf32> to vector<6x16xf32>
    %13 = arith.addf %11, %12 : vector<6x16xf32>
    %cst_14 = arith.constant dense<0.000000e+00> : vector<8x16xf32>
    %14 = tpu.matmul %2, %10, %cst_14 {dimension_numbers = #tpu.dot_dimension_numbers<[1], [0], [0], [1], [0, 0, 1, 1], [], []>} : vector<8x4xf32>, vector<4x16xf32>, vector<8x16xf32> -> vector<8x16xf32>
    %c15_i32_15 = arith.constant 15 : i32
    %15 = tpu.dynamic_rotate %10 by %c15_i32_15 dim 1 : vector<4x16xf32>, i32 -> vector<4x16xf32>
    %cst_16 = arith.constant 0.000000e+00 : f32
    %16 = vector.shape_cast %8 : vector<1x16xi1> to vector<1x16xi1>
    %17 = vector.broadcast %16 : vector<1x16xi1> to vector<4x16xi1>
    %18 = vector.broadcast %cst_16 : f32 to vector<4x16xf32>
    %19 = arith.select %17, %15, %18 : vector<4x16xi1>, vector<4x16xf32>
    %cst_17 = arith.constant dense<0.000000e+00> : vector<8x16xf32>
    %20 = tpu.matmul %3, %19, %cst_17 {dimension_numbers = #tpu.dot_dimension_numbers<[1], [0], [0], [1], [0, 0, 1, 1], [], []>} : vector<8x4xf32>, vector<4x16xf32>, vector<8x16xf32> -> vector<8x16xf32>
    %21 = arith.addf %14, %20 : vector<8x16xf32>
    %cst_18 = arith.constant 0.000000e+00 : f32
    %22 = vector.broadcast %cst_18 : f32 to vector<8x16xf32>
    %23 = arith.cmpf ogt, %21, %22 : vector<8x16xf32>
    %cst_19 = arith.constant 0.000000e+00 : f32
    %24 = vector.broadcast %cst_19 : f32 to vector<8x16xf32>
    %25 = arith.minimumf %21, %24 : vector<8x16xf32>
    %26 = math.exp %25 : vector<8x16xf32>
    %cst_20 = arith.constant 1.000000e+00 : f32
    %27 = vector.broadcast %cst_20 : f32 to vector<8x16xf32>
    %28 = arith.subf %26, %27 : vector<8x16xf32>
    %29 = arith.select %23, %21, %28 : vector<8x16xi1>, vector<8x16xf32>
    %cst_21 = arith.constant dense<0.000000e+00> : vector<6x16xf32>
    %30 = tpu.matmul %4, %29, %cst_21 {dimension_numbers = #tpu.dot_dimension_numbers<[1], [0], [0], [1], [0, 0, 1, 1], [], []>} : vector<6x8xf32>, vector<8x16xf32>, vector<6x16xf32> -> vector<6x16xf32>
    %c15_i32_22 = arith.constant 15 : i32
    %31 = tpu.dynamic_rotate %29 by %c15_i32_22 dim 1 : vector<8x16xf32>, i32 -> vector<8x16xf32>
    %cst_23 = arith.constant 0.000000e+00 : f32
    %32 = vector.shape_cast %8 : vector<1x16xi1> to vector<1x16xi1>
    %33 = vector.broadcast %32 : vector<1x16xi1> to vector<8x16xi1>
    %34 = vector.broadcast %cst_23 : f32 to vector<8x16xf32>
    %35 = arith.select %33, %31, %34 : vector<8x16xi1>, vector<8x16xf32>
    %cst_24 = arith.constant dense<0.000000e+00> : vector<6x16xf32>
    %36 = tpu.matmul %5, %35, %cst_24 {dimension_numbers = #tpu.dot_dimension_numbers<[1], [0], [0], [1], [0, 0, 1, 1], [], []>} : vector<6x8xf32>, vector<8x16xf32>, vector<6x16xf32> -> vector<6x16xf32>
    %37 = arith.addf %30, %36 : vector<6x16xf32>
    %38 = arith.addf %37, %13 : vector<6x16xf32>
    %cst_25 = arith.constant 0.000000e+00 : f32
    %39 = vector.broadcast %cst_25 : f32 to vector<6x16xf32>
    %40 = arith.cmpf ogt, %38, %39 : vector<6x16xf32>
    %cst_26 = arith.constant 0.000000e+00 : f32
    %41 = vector.broadcast %cst_26 : f32 to vector<6x16xf32>
    %42 = arith.minimumf %38, %41 : vector<6x16xf32>
    %43 = math.exp %42 : vector<6x16xf32>
    %cst_27 = arith.constant 1.000000e+00 : f32
    %44 = vector.broadcast %cst_27 : f32 to vector<6x16xf32>
    %45 = arith.subf %43, %44 : vector<6x16xf32>
    %46 = arith.select %40, %38, %45 : vector<6x16xi1>, vector<6x16xf32>
    %c0_28 = arith.constant 0 : index
    %c0_29 = arith.constant 0 : index
    %c0_30 = arith.constant 0 : index
    %47 = vector.load %arg8[%c0_28, %c0_29, %c0_30] : memref<1x6x16xf32, #tpu.memory_space<vmem>>, vector<1x6x16xf32>
    %48 = vector.shape_cast %47 : vector<1x6x16xf32> to vector<6x16xf32>
    %49 = vector.shape_cast %46 : vector<6x16xf32> to vector<1x6x16xf32>
    tpu.vector_store %arg8[%c0_28, %c0_29, %c0_30], %49 {strides = array<i32>} : memref<1x6x16xf32, #tpu.memory_space<vmem>>, vector<1x6x16xf32>,
    return
  }
  func.func @transform_0(%arg0: i32) -> (i32, i32, i32) {
    %c0_i32 = arith.constant 0 : i32
    %c0_i32_0 = arith.constant 0 : i32
    %c0_i32_1 = arith.constant 0 : i32
    return %arg0, %c0_i32, %c0_i32_0 : i32, i32, i32
  }
  func.func @transform_1(%arg0: i32) -> (i32, i32) {
    %c0_i32 = arith.constant 0 : i32
    %c0_i32_0 = arith.constant 0 : i32
    %c0_i32_1 = arith.constant 0 : i32
    return %c0_i32, %c0_i32_0 : i32, i32
  }
  func.func @transform_2(%arg0: i32) -> (i32, i32) {
    %c0_i32 = arith.constant 0 : i32
    %c0_i32_0 = arith.constant 0 : i32
    %c0_i32_1 = arith.constant 0 : i32
    return %c0_i32, %c0_i32_0 : i32, i32
  }
  func.func @transform_3(%arg0: i32) -> (i32, i32) {
    %c0_i32 = arith.constant 0 : i32
    %c0_i32_0 = arith.constant 0 : i32
    %c0_i32_1 = arith.constant 0 : i32
    return %c0_i32, %c0_i32_0 : i32, i32
  }
  func.func @transform_4(%arg0: i32) -> (i32, i32) {
    %c0_i32 = arith.constant 0 : i32
    %c0_i32_0 = arith.constant 0 : i32
    %c0_i32_1 = arith.constant 0 : i32
    return %c0_i32, %c0_i32_0 : i32, i32
  }
  func.func @transform_5(%arg0: i32) -> (i32, i32) {
    %c0_i32 = arith.constant 0 : i32
    %c0_i32_0 = arith.constant 0 : i32
    %c0_i32_1 = arith.constant 0 : i32
    return %c0_i32, %c0_i32_0 : i32, i32
  }
  func.func @transform_6(%arg0: i32) -> (i32, i32) {
    %c0_i32 = arith.constant 0 : i32
    %c0_i32_0 = arith.constant 0 : i32
    %c0_i32_1 = arith.constant 0 : i32
    return %c0_i32, %c0_i32_0 : i32, i32
  }
  func.func @transform_7(%arg0: i32) -> (i32, i32, i32) {
    %c0_i32 = arith.constant 0 : i32
    %c0_i32_0 = arith.constant 0 : i32
    %c0_i32_1 = arith.constant 0 : i32
    return %arg0, %c0_i32, %c0_i32_0 : i32, i32, i32
  }
}

</mosaic_0001>

<bundles_post_ra>
// kernel: tpu_custom_call.1
= control target key start
LH: loop header
LB: loop body
LE: loop exit
PB: predicated region body
PF: predicated region fallthrough
CT: control target
= control target key end

     0   :  { %s593_s24 = smov 0   ;;  %s648_s0 = inlined_call_operand.vmem [shape: f32[2,4,16], index: 0, kind: input, shape index: {}]   ;;  %s649_s1 = inlined_call_operand.vmem [shape: f32[6,4], index: 1, kind: input, shape index: {}]   ;;  %s650_s2 = inlined_call_operand.vmem [shape: f32[6,1], index: 2, kind: input, shape index: {}]   ;;  %s651_s3 = inlined_call_operand.vmem [shape: f32[8,4], index: 3, kind: input, shape index: {}]   ;;  %s652_s4 = inlined_call_operand.vmem [shape: f32[8,4], index: 4, kind: input, shape index: {}]   ;;  %s653_s5 = inlined_call_operand.vmem [shape: f32[6,8], index: 5, kind: input, shape index: {}]   ;;  %s654_s6 = inlined_call_operand.vmem [shape: f32[6,8], index: 6, kind: input, shape index: {}]   ;;  %s655_s7 = inlined_call_operand.vmem [shape: f32[2,6,16], index: 7, kind: output, shape index: {}]  }
   0x1 LB: > { %s506_s25 = sadd.s32 4294967295, %s548_s24   ;;  %p510_p0 = scmp.ge.s32.totalorder %s548_s24, 1  ;;  %s548_s24 = sphi %s593_s24, %s17_s24  }
   0x2   : > { %p236_p1 = scmp.lt.s32.totalorder %s548_s24, 3 }
   0x4   : > { %p237_p2 = pnand %p510_p0, %p236_p1 }
   0x5   : > { %p266_p3 = scmp.lt.s32.totalorder (!%p237_p2), %s506_s25, 1  ;;  %s550_s30 = smov (!%p237_p2), 16  }
   0x6   : > { %240 = sbr.rel (%p237_p2) target bundleno = 957 (0x3bd), region = 48  ;;  %s551_s10 = smov (!%p237_p2), 127  }
   0xb   : > { %s657_s25 = smov (!%p266_p3, %s506_s25), 1  ;;  %vm317_vm0 = vcmask 1047680   ;;  %vm293_vm1 = vcmask 1043456   ;;  %v276_v3 = vld [vmem:[%s651_s3] sm:$0xff]  ;;  %vm289_vm2 = vcmask 31744   ;;  %v280_v6 = vlaneseq }
   0xc   : > { %s511_s26 = sshll.u32 %s657_s25, 2  ;;  %v277_v9 = vld [vmem:[%s652_s4] sm:$0xff]  ;;  %v552_v25 = vmov 0   ;;  %vm397_vm5 = vcmask 64512   ;;  %s512_s21 = sshll.u32 %s657_s25, 3  ;;  %vm451_vm6 = vcmask 128000  }
   0xd   : > { %s269_s29 = scalar_lea.vmem %s648_s0, %s511_s26  ;;  %v281_v7 = vand.u32 127, %v280_v6  ;;  %v274_v23 = vld [vmem:[%s649_s1] sm:$0x3f]  ;;  %537 = vset.pattern.permute.xlu0 %v552_v25  ;;  %s273_s26 = scalar_lea.vmem %s655_s7, %s512_s21 }
   0xe   : > { %v283_v0 = vld [vmem:[%s269_s29] sm:$0xf] }
   0xf   : > { %318 = vrot.lane.b32.xlu0 %v283_v0, %s550_s30  ;;  %517 = vmatpush.msk.msra.mxu2 %vm293_vm1, %v283_v0  ;;  %vm282_vm3 = vcmp.lt.s32.totalorder %v281_v7, 15  ;;  %v275_v24 = vld [vmem:[%s650_s2] sm:$0x3f] }
  0x10   : > { %513 = vmatpush.msk.msra.mxu0 %vm293_vm1, %v283_v0  ;;  %518 = vmatmul.msk.f32.vlgmr.msra.gmra.mxu2 %vm289_vm2, %v276_v3  ;;  %v278_v26 = vld [vmem:[%s653_s5] sm:$0x3f] }
  0x11   : > { %514 = vmatmul.msk.f32.vlgmr.msra.gmra.mxu0 %vm289_vm2, %v274_v23  ;;  %v279_v27 = vld [vmem:[%s654_s6] sm:$0x3f] }
  0x81   : > { %v319_v1 = vpop.permute.xlu0 %318 }
  0x82   : > { %v320_v2 = vsel %vm317_vm0, %v319_v1, %v283_v0 }
  0x83   : > { %321 = vrot.lane.b32.xlu0 %v320_v2, %s550_s30 }
  0x8b   : > { %286 = vperm.xlu0 %537, %v275_v24  }
  0x8e   : > { %v314_v29 = vpop.f32.mrf.mxu0 }
  0x93   : > { %v377_v11 = vpop.f32.mrf.mxu2 }
  0xf5   : > { %v322_v4 = vpop.permute.xlu0 %321 }
  0xf6   : > { %v323_v5 = vsel %vm317_vm0, %v322_v4, %v283_v0 }
  0xf7   : > { %327 = vrot.lane.b32.xlu1 %v323_v5, %s551_s10 }
  0xfd   : > { %v287_v30 = vpop.permute.xlu0 %286 }
  0xfe   : > { %v315_v33 = vadd.f32 %v314_v29, %v287_v30 }
 0x169   : > { %v328_v8 = vpop.permute.xlu1 %327 }
 0x16a   : > { %v330_v10 = vsel %vm282_vm3, %v328_v8, 0.0 }
 0x16b   : > { %515 = vmatpush.msk.msra.mxu1 %vm293_vm1, %v330_v10 }
 0x16c   : > { %516 = vmatmul.msk.f32.vlgmr.msra.gmra.mxu1 %vm289_vm2, %v277_v9 }
 0x1e9   : > { %v354_v12 = vpop.f32.mrf.mxu1 }
 0x1ea   : > { %v378_v13 = vadd.f32 %v377_v11, %v354_v12 }
 0x1ec   : > { %v381_v14 = vmin.f32 %v378_v13, 0.0  ;;  %vm380_vm4 = vcmp.gt.f32.partialorder %v378_v13, 0.0 }
 0x1ee   : > { %v382_v15 = vmul.f32 1.442695, %v381_v14 }
 0x1f0   : > { %538 = vpow2.f32 %v382_v15 }
 0x1f6   : > { %v539_v16 = vpop.eup %538 }
 0x1f7   : > { %v519_v17 = vadd.f32 -1.0, %v539_v16 }
 0x1f9   : > { %v385_v18 = vsel %vm380_vm4, %v378_v13, %v519_v17 }
 0x1fa   : > { %386 = vrot.lane.b32.xlu1 %v385_v18, %s550_s30  ;;  %439 = vmatpush.msrb.mxu0 %v385_v18 }
 0x1fb   : > { %522 = vmatmul.msk.f32.vlgmr.msrb.gmra.mxu0 %vm397_vm5, %v278_v26 }
 0x26c   : > { %v387_v19 = vpop.permute.xlu1 %386 }
 0x26d   : > { %v388_v20 = vsel %vm317_vm0, %v387_v19, %v385_v18 }
 0x26e   : > { %389 = vrot.lane.b32.xlu2 %v388_v20, %s550_s30 }
 0x278   : > { %v441_v31 = vpop.f32.mrf.mxu0 }
 0x2c8   : > { %v390_v21 = vpop.permute.xlu2 %389 }
 0x2c9   : > { %v391_v22 = vsel %vm317_vm0, %v390_v21, %v385_v18 }
 0x2ca   : > { %393 = vrot.lane.b32.xlu2 %v391_v22, %s551_s10 }
 0x324   : > { %v394_v28 = vpop.permute.xlu2 %393 }
 0x325   : > { %520 = vmatpush.msk.msra.mxu3 %vm282_vm3, %v394_v28 }
 0x326   : > { %521 = vmatmul.msk.f32.vlgmr.msra.gmra.mxu3 %vm397_vm5, %v279_v27 }
 0x3a9   : > { %v418_v32 = vpop.f32.mrf.mxu3 }
 0x3aa   : > { %v442_v34 = vadd.f32 %v441_v31, %v418_v32 }
 0x3ac   : > { %v444_v35 = vadd.f32 %v442_v34, %v315_v33 }
 0x3ae   : > { %v446_v36 = vmin.f32 %v444_v35, 0.0  ;;  %vm445_vm7 = vcmp.gt.f32.partialorder %v444_v35, 0.0 }
 0x3b0   : > { %v447_v37 = vmul.f32 1.442695, %v446_v36 }
 0x3b2   : > { %540 = vpow2.f32 %v447_v37 }
 0x3b8   : > { %v541_v38 = vpop.eup %540 }
 0x3b9   : > { %v523_v39 = vadd.f32 -1.0, %v541_v38 }
 0x3bb   : > { %v450_v40 = vsel %vm445_vm7, %v444_v35, %v523_v39 }
 0x3bc   : > { %452 = vst.msk [vmem:[%s273_s26] sm:$0x3f] %vm451_vm6, %v450_v40 }
 0x3bd PF: > { %s17_s24 = sadd.s32 1, %s548_s24  }
 0x3be   : > { %p14_p4 = scmp.ge.s32.totalorder %s17_s24, 4  }
 0x3c0   :  { %16 = sbr.rel (!%p14_p4) target bundleno = 1 (0x1), region = 78 }

</bundles_post_ra>
